<compile_context>
chip_gen: v6e
topology: v6e:2x2x1
jax: 0.10.0
libtpu: 0.0.40
codegen_flags: <defaults>
</compile_context>

<pallas_src>
import functools
from dataclasses import dataclass

import jax
import jax.numpy as jnp
from jax.experimental import pallas as pl
from jax.experimental.pallas import tpu as pltpu


_LANE_CANDIDATES = (4096, 2048, 1024, 512, 256, 128)
_PIPELINE_BYTES = 8 * 1024 * 1024   # below this, >=2 grid steps is enough


@dataclass(frozen=True)
class _GenConfig:
    block_bytes: int            # target bytes per (in or out) block
    min_pallas_bytes: int       # below this, plain XLA fusion wins
    min_steps: int              # min grid steps for slabs >= _PIPELINE_BYTES
    even_steps: bool            # balance the 2 TensorCores on v7x
    native_low_precision: bool  # bf16 VALU available -> compute bf16 natively
    vmem_limit_bytes: int | None


@functools.lru_cache(maxsize=None)
def _gen_config() -> _GenConfig:
    try:
        kind = jax.devices()[0].device_kind.lower()
    except Exception:  # pragma: no cover - defensive
        kind = ""
    if "v7" in kind or "tpu7" in kind:
        # v7x: half the VMEM, ~2.3x the HBM BW, 2 TCs -> modest blocks, more
        # (even) grid steps, higher Pallas/XLA crossover.
        return _GenConfig(block_bytes=2 << 20, min_pallas_bytes=4 << 20,
                          min_steps=8, even_steps=True,
                          native_low_precision=True, vmem_limit_bytes=32 << 20)
    if "v6" in kind:
        # v6e: ~4 MiB blocks creep closer to the HBM roofline; 4 blocks
        # (double-buffered in+out) = 16 MiB, well inside the 32 MiB limit set.
        return _GenConfig(block_bytes=4 << 20, min_pallas_bytes=1 << 20,
                          min_steps=4, even_steps=False,
                          native_low_precision=True, vmem_limit_bytes=32 << 20)
    # v5e and older (no bf16 VALU), or unknown backend: conservative defaults.
    # Keep 2 MiB blocks (8 MiB total) within v5e's 16 MiB default scoped VMEM.
    return _GenConfig(block_bytes=2 << 20, min_pallas_bytes=1 << 20,
                      min_steps=4, even_steps=False,
                      native_low_precision=False, vmem_limit_bytes=None)


def _make_hardswish_kernel(compute_dtype):
    def kernel(x_ref, o_ref):
        x = x_ref[...].astype(compute_dtype)          # no-op cast when dtypes match
        r6 = jnp.clip(x + 3.0, 0.0, 6.0)               # relu6(x + 3); weak scalars keep dtype
        o_ref[...] = (x * r6 * (1.0 / 6.0)).astype(o_ref.dtype)
    return kernel


def _hardswish_jnp(x):
    xf = x.astype(jnp.float32)
    return (xf * jnp.clip(xf + 3.0, 0.0, 6.0) * (1.0 / 6.0)).astype(x.dtype)


def _round_up(a, b):
    return -(-a // b) * b


def _hardswish_slab(x2d, cfg: _GenConfig):
    """HardSwish on a 2-D (rows, lanes) slab; lanes is a multiple of 128."""
    rows, lanes = x2d.shape
    itemsize = jnp.dtype(x2d.dtype).itemsize
    row_align = max(8, 32 // itemsize)          # sublane packing: f32->8, bf16->16, i8->32
    total_bytes = rows * lanes * itemsize

    # Row-tile sized toward cfg.block_bytes, multiple of row_align.
    tr = max(row_align, (cfg.block_bytes // (lanes * itemsize)) // row_align * row_align)

    # Keep enough grid steps for the software pipeline (and the v7x 2-TC split).
    min_steps = cfg.min_steps if total_bytes >= _PIPELINE_BYTES else 2
    if rows > row_align:
        tr = min(tr, _round_up(pl.cdiv(rows, min_steps), row_align))
    tr = min(tr, rows)   # tr == rows -> block dim equals full array dim (allowed)

    # v7x: prefer an even step count so both TensorCores get balanced shares.
    if cfg.even_steps and rows > row_align:
        steps = pl.cdiv(rows, tr)
        if steps > 1 and steps % 2 == 1:
            tr2 = min(rows, max(row_align, _round_up(pl.cdiv(rows, steps + 1), row_align)))
            if pl.cdiv(rows, tr2) % 2 == 0:
                tr = tr2

    # bf16 math natively on chips with a bf16 VALU; f32 intermediates otherwise
    # (better accuracy, and v5e has no bf16 VALU).  fp16 always goes via f32.
    if cfg.native_low_precision and x2d.dtype == jnp.bfloat16:
        compute_dtype = jnp.bfloat16
    else:
        compute_dtype = jnp.float32

    grid = (pl.cdiv(rows, tr),)   # partial tail block (if any) handled by Pallas
    return pl.pallas_call(
        _make_hardswish_kernel(compute_dtype),
        out_shape=jax.ShapeDtypeStruct((rows, lanes), x2d.dtype),
        grid_spec=pltpu.PrefetchScalarGridSpec(
            num_scalar_prefetch=0,
            grid=grid,
            in_specs=[pl.BlockSpec((tr, lanes), lambda i: (i, 0))],
            out_specs=pl.BlockSpec((tr, lanes), lambda i: (i, 0)),
        ),
        compiler_params=pltpu.CompilerParams(
            dimension_semantics=("parallel",),
            vmem_limit_bytes=cfg.vmem_limit_bytes,
        ),
    )(x2d)


def hardswish(x: jax.Array, *, min_pallas_bytes: int | None = None) -> jax.Array:
    """Elementwise HardSwish for any shape/dtype (matches x * relu6(x+3) / 6)."""
    n = x.size
    if n == 0:
        return x
    cfg = _gen_config()
    if min_pallas_bytes is None:
        min_pallas_bytes = cfg.min_pallas_bytes
    if n * x.dtype.itemsize < min_pallas_bytes:
        # Tiny input: pallas_call launch/pipeline warmup dominates; let XLA fuse.
        return _hardswish_jnp(x)

    orig_shape = x.shape
    xf = jnp.ravel(x)

    # Common case: widest lane count that divides n -> no pad / slice copies.
    lanes = next((l for l in _LANE_CANDIDATES if n % l == 0), None)
    if lanes is not None:
        return _hardswish_slab(xf.reshape(n // lanes, lanes), cfg).reshape(orig_shape)

    # Ragged size (n not a multiple of 128): no full-array zero-pad + slice-back.
    # Stream the largest 128-multiple prefix through the slab kernel and handle
    # the tiny (<128 element) tail with plain jnp.
    bulk = (n // 128) * 128
    if bulk == 0:
        return _hardswish_jnp(x)
    lanes = next(l for l in _LANE_CANDIDATES if bulk % l == 0)
    head = _hardswish_slab(xf[:bulk].reshape(bulk // lanes, lanes), cfg).reshape(-1)
    tail = _hardswish_jnp(xf[bulk:])
    return jnp.concatenate([head, tail]).reshape(orig_shape)


if __name__ == "__main__":
    key = jax.random.PRNGKey(0)
    k1, k2, k3 = jax.random.split(key, 3)

    def ref(x):
        xf = x.astype(jnp.float32)
        return (xf * jnp.clip(xf + 3.0, 0.0, 6.0) / 6.0).astype(x.dtype)

    # 1) Small NCHW input (as the PyTorch module would see); force the Pallas
    #    path so the kernel itself is exercised at this size.
    x_small = jax.random.normal(k1, (2, 4, 16, 16), dtype=jnp.float32) * 4.0
    y_small = hardswish(x_small, min_pallas_bytes=0)
    jax.block_until_ready(y_small)
    assert y_small.shape == x_small.shape and y_small.dtype == x_small.dtype
    assert jnp.allclose(y_small, ref(x_small), atol=1e-5, rtol=1e-5)

    # Default (small-input fast) path on the same input.
    y_fast = hardswish(x_small)
    jax.block_until_ready(y_fast)
    assert jnp.allclose(y_fast, ref(x_small), atol=1e-5, rtol=1e-5)

    # 2) Larger activation; force Pallas so the multi-block path runs on every
    #    generation regardless of the crossover threshold.
    x_big = jax.random.normal(k2, (2, 32, 64, 64), dtype=jnp.float32) * 4.0
    y_big = hardswish(x_big, min_pallas_bytes=0)
    jax.block_until_ready(y_big)
    assert jnp.allclose(y_big, ref(x_big), atol=1e-5, rtol=1e-5)

    # 3) Awkward (non-multiple-of-128) size: exercises the prefix+tail fallback.
    x_odd = jax.random.normal(k3, (3, 5, 7, 11), dtype=jnp.float32) * 4.0
    y_odd = hardswish(x_odd, min_pallas_bytes=0)
    jax.block_until_ready(y_odd)
    assert jnp.allclose(y_odd, ref(x_odd), atol=1e-5, rtol=1e-5)

    # 4) bf16 input through the Pallas path (native bf16 math on v6e/v7x,
    #    f32 intermediates on v5e) — slightly looser tolerance.
    x_bf16 = x_big.astype(jnp.bfloat16)
    y_bf16 = hardswish(x_bf16, min_pallas_bytes=0)
    jax.block_until_ready(y_bf16)
    assert y_bf16.dtype == jnp.bfloat16 and y_bf16.shape == x_bf16.shape
    assert jnp.allclose(y_bf16.astype(jnp.float32),
                        ref(x_bf16).astype(jnp.float32), atol=3e-2, rtol=3e-2)

    print("KERNEL_OK")
</pallas_src>

<mosaic_0001>
module attributes {stable_mosaic.version = 11 : i64} {
  func.func @kernel(%arg0: i32, %arg1: memref<1x2048xf32, #tpu.memory_space<vmem>>, %arg2: memref<1x2048xf32, #tpu.memory_space<vmem>>) attributes {dimension_semantics = [#tpu.dimension_semantics<parallel>], iteration_bounds = array<i64: 1>, scalar_prefetch = 0 : i64, scratch_operands = 0 : i64, tpu.core_type = #tpu.core_type<tc>, window_params = [{transform_indices = @transform_0, window_bounds = array<i64: 1, 2048>}, {transform_indices = @transform_1, window_bounds = array<i64: 1, 2048>}]} {
    %c0 = arith.constant 0 : index
    %c0_0 = arith.constant 0 : index
    %0 = vector.load %arg1[%c0, %c0_0] : memref<1x2048xf32, #tpu.memory_space<vmem>>, vector<1x2048xf32>
    %cst = arith.constant 3.000000e+00 : f32
    %1 = vector.broadcast %cst : f32 to vector<1x2048xf32>
    %2 = arith.addf %0, %1 : vector<1x2048xf32>
    %cst_1 = arith.constant 0.000000e+00 : f32
    %cst_2 = arith.constant 6.000000e+00 : f32
    %3 = vector.broadcast %cst_1 : f32 to vector<1x2048xf32>
    %4 = arith.maximumf %3, %2 : vector<1x2048xf32>
    %5 = vector.broadcast %cst_2 : f32 to vector<1x2048xf32>
    %6 = arith.minimumf %5, %4 : vector<1x2048xf32>
    %7 = arith.mulf %0, %6 : vector<1x2048xf32>
    %cst_3 = arith.constant 0.166666672 : f32
    %8 = vector.broadcast %cst_3 : f32 to vector<1x2048xf32>
    %9 = arith.mulf %7, %8 : vector<1x2048xf32>
    %c0_4 = arith.constant 0 : index
    %c0_5 = arith.constant 0 : index
    %10 = vector.load %arg2[%c0_4, %c0_5] : memref<1x2048xf32, #tpu.memory_space<vmem>>, vector<1x2048xf32>
    tpu.vector_store %arg2[%c0_4, %c0_5], %9 {strides = array<i32>} : memref<1x2048xf32, #tpu.memory_space<vmem>>, vector<1x2048xf32>,
    return
  }
  func.func @transform_0(%arg0: i32) -> (i32, i32) {
    %c0_i32 = arith.constant 0 : i32
    %c0_i32_0 = arith.constant 0 : i32
    return %arg0, %c0_i32 : i32, i32
  }
  func.func @transform_1(%arg0: i32) -> (i32, i32) {
    %c0_i32 = arith.constant 0 : i32
    %c0_i32_0 = arith.constant 0 : i32
    return %arg0, %c0_i32 : i32, i32
  }
}

</mosaic_0001>

<bundles_post_ra>
// kernel: tpu_custom_call.1
= control target key start
LH: loop header
LB: loop body
LE: loop exit
PB: predicated region body
PF: predicated region fallthrough
CT: control target
= control target key end

     0   :  { %6 = vsyncpa [#allocation3], 0  ;;  %s114_s0 = inlined_call_operand.hbm [shape: f32[1,2048], index: 0, kind: input, shape index: {}]   ;;  %s115_s1 = inlined_call_operand.hbm [shape: f32[1,2048], index: 1, kind: output, shape index: {}]  }
   0x1   :  { %7 = vsyncpa [#allocation4], 0  ;;  %s96_s6 = smov [#allocation2]  }
   0x2   :  { %s14_s7 = sshll.u32 %s96_s6, 4  ;;  %s15_s7 = int_to_ptr.vmem [resolvable:$true] %s14_s7 }
   0x3   :  { %s60_s8 = scalar_lea.vmem %s15_s7, 256  ;;  %p65_p1 = scmp.lt.s32.totalorder %s15_s7, %s15_s7 }
   0x4   :  { %p61_p0 = scmp.ne.s32.totalorder %s15_s7, %s60_s8  ;;  %p66_p2 = scmp.lt.s32.totalorder %s60_s8, %s60_s8 }
   0x6   :  { %p67_p3 = por %p66_p2, %p65_p1 }
   0x8   :  { %p68_p4 = pnand %p67_p3, %p61_p0 }
   0xa   :  { %71 = shalt.err (!%p68_p4)
}
   0xb   :  { %17 = dma.hbm_to_vmem [thread:$0]  %s114_s0, 256, %s15_s7, [#allocation3]  }
   0xc   :  { %92 = dma.done.wait [#allocation3], 256  }
   0xd   :  { %93 = vsyncadd [#allocation3], 4294967040  ;;  %v21_v0 = vld [vmem:[#allocation2] sm:$0xff]  ;;  %v22_v1 = vld [vmem:[#allocation2 + $0x8] sm:$0xff]  ;;  %s97_s11 = smov [#allocation5]  }
   0xe   :  { %v23_v2 = vadd.f32 3.0, %v21_v0  ;;  %v24_v3 = vadd.f32 3.0, %v22_v1  ;;  %s41_s12 = sshll.u32 %s97_s11, 4  ;;  %s42_s12 = int_to_ptr.vmem [resolvable:$true] %s41_s12 }
   0xf   :  { %s72_s0 = scalar_lea.vmem %s42_s12, 256  ;;  %p77_p6 = scmp.lt.s32.totalorder %s42_s12, %s42_s12 }
  0x10   :  { %v25_v4 = vmax.f32 %v23_v2, 0.0  ;;  %v26_v5 = vmax.f32 %v24_v3, 0.0  ;;  %p73_p5 = scmp.ne.s32.totalorder %s42_s12, %s72_s0  ;;  %p78_p7 = scmp.lt.s32.totalorder %s72_s0, %s72_s0 }
  0x12   :  { %v27_v6 = vmin.f32 %v25_v4, 6.0  ;;  %v28_v7 = vmin.f32 %v26_v5, 6.0  ;;  %p79_p8 = por %p78_p7, %p77_p6 }
  0x14   :  { %v29_v8 = vmul.f32 %v27_v6, %v21_v0  ;;  %v30_v9 = vmul.f32 %v28_v7, %v22_v1  ;;  %p80_p9 = pnand %p79_p8, %p73_p5 }
  0x16   :  { %v31_v10 = vmul.f32 0.16666667, %v29_v8  ;;  %v32_v11 = vmul.f32 0.16666667, %v30_v9 }
  0x18   :  { %33 = vst [vmem:[#allocation5] sm:$0xff] %v31_v10  ;;  %34 = vst [vmem:[#allocation5 + $0x8] sm:$0xff] %v32_v11 }
  0x19   :  { %83 = shalt.err (!%p80_p9)
}
  0x1a   :  { %44 = dma.vmem_to_hbm [thread:$0]  %s42_s12, 256, %s115_s1, [#allocation4]  }
  0x1b   :  { %94 = dma.done.wait [#allocation4], 256  }
  0x1c   :  { %95 = vsyncadd [#allocation4], 4294967040 }
  0x1d   :  { %48 = vsyncpa [#allocation3], 1 }
  0x1e   :  { %49 = vsyncpa [#allocation4], 1 }

</bundles_post_ra>
